<compile_context>
chip_gen: v7x
topology: tpu7x:2x2x1
jax: 0.10.0
libtpu: 0.0.40
codegen_flags: <defaults>
</compile_context>

<pallas_src>
import jax
import jax.numpy as jnp
from jax.experimental import pallas as pl
from jax.experimental.pallas import tpu as pltpu

LN_EPS = 1e-5


def _cnn_embedding_kernel(x_ref, params_ref, stats_ref, o_ref):
    # x_ref:      (tn, 1)  flattened (batch*seq) inputs, f32
    # params_ref: (3, E)   rows: A=(w-mean_w)*gamma, B=(b-mean_b)*gamma, beta
    # stats_ref:  (3,)     SMEM scalars: [Var(w), 2*Cov(w,b), Var(b)]
    # o_ref:      (tn, E)  output (f32 or bf16)
    x = x_ref[...]                                    # (tn, 1)

    var_w = stats_ref[0]
    cov2 = stats_ref[1]
    var_b = stats_ref[2]

    # Closed-form per-row LayerNorm variance of y = x*w + b (no lane reductions).
    var = (x * x) * var_w + x * cov2 + var_b          # (tn, 1)
    var = jnp.maximum(var, 0.0)                       # guard f32 cancellation / OOB garbage rows
    r = jax.lax.rsqrt(var + LN_EPS)                   # (tn, 1)  -> EUP

    a = params_ref[0:1, :]                            # (1, E)
    b = params_ref[1:2, :]                            # (1, E)
    beta = params_ref[2:3, :]                         # (1, E)

    # relu(r*(x*A + B) + beta): 5 VPU ops per output element, broadcast FMAs only.
    y = r * (x * a + b) + beta                        # (tn, E)
    o_ref[...] = jnp.maximum(y, 0.0).astype(o_ref.dtype)


def _auto_row_tile(n_rows, embed_dim, out_itemsize, target_block_bytes, vmem_limit_bytes):
    """Rows per grid step, multiple of 8, sized against lane-padded double-buffered VMEM."""
    lane_pad = ((max(embed_dim, 1) + 127) // 128) * 128
    # Double-buffered per-row VMEM footprint:
    #   x block   (row_tile, 1) f32 -> lane-padded to 128 lanes = 512 B/row
    #   out block (row_tile, E)     -> itemsize * lane_pad B/row
    bytes_per_row = 2 * (512 + out_itemsize * lane_pad)
    vmem_cap = max(8, int(vmem_limit_bytes * 0.75) // bytes_per_row)
    target = max(8, target_block_bytes // (out_itemsize * max(embed_dim, 1)))
    # Keep >= 4 grid blocks for medium/large N so ("parallel",) can split work
    # across the two TensorCores on v7x (no-op on single-TC v5e/v6e).
    four_way = max(8, -(-n_rows // 4))
    n_cap = ((n_rows + 7) // 8) * 8
    rows = min(target, vmem_cap, four_way, n_cap)
    return max(8, (rows // 8) * 8)


def cnn_embedding(x, conv_w, conv_b, ln_g, ln_b, *,
                  row_tile=None,
                  out_dtype=None,
                  target_block_bytes=8 * 1024 * 1024,
                  vmem_limit_bytes=48 * 1024 * 1024):
    """x: (B, L) float.  conv_w: (E, 1, 1), conv_b/ln_g/ln_b: (E,).  Returns (B, L, E)."""
    B, L = x.shape
    E = conv_w.shape[0]
    N = B * L
    out_dtype = jnp.dtype(out_dtype) if out_dtype is not None else jnp.dtype(x.dtype)

    w = conv_w.reshape(E).astype(jnp.float32)
    b = conv_b.reshape(E).astype(jnp.float32)
    g = ln_g.reshape(E).astype(jnp.float32)
    beta = ln_b.reshape(E).astype(jnp.float32)

    # Closed-form LN statistics of y = x*w + b over the E axis (population moments).
    mean_w = jnp.mean(w)
    mean_b = jnp.mean(b)
    wc = w - mean_w
    bc = b - mean_b
    var_w = jnp.mean(wc * wc)
    cov_wb = jnp.mean(wc * bc)
    var_b = jnp.mean(bc * bc)
    stats = jnp.stack([var_w, 2.0 * cov_wb, var_b]).astype(jnp.float32)       # (3,) -> SMEM

    # Fold LN gamma into the centered conv params; pack into one (3, E) operand.
    params = jnp.stack([wc * g, bc * g, beta]).astype(jnp.float32)            # (3, E)

    if row_tile is None:
        row_tile = _auto_row_tile(N, E, out_dtype.itemsize,
                                  target_block_bytes, vmem_limit_bytes)
    assert row_tile >= 8 and row_tile % 8 == 0, "row_tile must be a positive multiple of 8"

    num_blocks = pl.cdiv(N, row_tile)                 # boundary block clipped by Pallas
    x_flat = x.reshape(N, 1).astype(jnp.float32)      # no padding: metadata-only reshape

    out_flat = pl.pallas_call(
        _cnn_embedding_kernel,
        out_shape=jax.ShapeDtypeStruct((N, E), out_dtype),
        grid_spec=pltpu.PrefetchScalarGridSpec(
            num_scalar_prefetch=0,
            grid=(num_blocks,),
            in_specs=[
                pl.BlockSpec((row_tile, 1), lambda i: (i, 0)),               # x rows
                pl.BlockSpec((3, E), lambda i: (0, 0)),                      # A / B / beta
                pl.BlockSpec(memory_space=pltpu.MemorySpace.SMEM),           # stats scalars
            ],
            out_specs=pl.BlockSpec((row_tile, E), lambda i: (i, 0)),
        ),
        compiler_params=pltpu.CompilerParams(
            dimension_semantics=("parallel",),
            vmem_limit_bytes=vmem_limit_bytes,
        ),
    )(x_flat, params, stats)

    return out_flat.reshape(B, L, E)


def _reference(x, conv_w, conv_b, ln_g, ln_b):
    """Pure-JAX reference mirroring the PyTorch forward (two-pass LayerNorm)."""
    y = x[:, :, None] * conv_w.reshape(1, 1, -1) + conv_b.reshape(1, 1, -1)   # (B, L, E)
    mean = jnp.mean(y, axis=-1, keepdims=True)
    var = jnp.mean((y - mean) ** 2, axis=-1, keepdims=True)
    y = (y - mean) / jnp.sqrt(var + LN_EPS) * ln_g + ln_b
    return jnp.maximum(y, 0.0)


if __name__ == "__main__":
    B, L, E = 2, 8, 32  # batch, sequence length, embedding_dim

    key = jax.random.PRNGKey(0)
    kx, kw, kb, kg, kbeta = jax.random.split(key, 5)

    x = jax.random.normal(kx, (B, L), dtype=jnp.float32)
    # Conv1d(1, E, 1) parameters: weight (E, 1, 1), bias (E,)
    conv_w = jax.random.normal(kw, (E, 1, 1), dtype=jnp.float32) * 0.5
    conv_b = jax.random.normal(kb, (E,), dtype=jnp.float32) * 0.1
    # LayerNorm(E) parameters (perturbed so the affine path is exercised).
    ln_g = 1.0 + 0.1 * jax.random.normal(kg, (E,), dtype=jnp.float32)
    ln_b = 0.1 * jax.random.normal(kbeta, (E,), dtype=jnp.float32)

    # Check 1: small demo shape, auto tile.
    out = jax.block_until_ready(cnn_embedding(x, conv_w, conv_b, ln_g, ln_b))
    ref = _reference(x, conv_w, conv_b, ln_g, ln_b)
    assert out.shape == (B, L, E), out.shape
    assert jnp.allclose(out, ref, atol=1e-5, rtol=1e-5), "mismatch vs reference (check 1)"

    # Check 2: non-divisible grid (N=200, row_tile=64 -> 4 blocks, last one partial).
    # Exercises Pallas boundary-block clipping with no x padding and no output slice.
    B2, L2 = 4, 50
    x2 = jax.random.normal(kx, (B2, L2), dtype=jnp.float32)
    out2 = jax.block_until_ready(
        cnn_embedding(x2, conv_w, conv_b, ln_g, ln_b, row_tile=64))
    ref2 = _reference(x2, conv_w, conv_b, ln_g, ln_b)
    assert out2.shape == (B2, L2, E), out2.shape
    assert jnp.allclose(out2, ref2, atol=1e-5, rtol=1e-5), "mismatch vs reference (check 2)"

    # Check 3: bf16 output path (f32 math in-kernel, cast only at the store).
    out3 = jax.block_until_ready(
        cnn_embedding(x2, conv_w, conv_b, ln_g, ln_b, row_tile=64, out_dtype=jnp.bfloat16))
    assert out3.dtype == jnp.bfloat16, out3.dtype
    assert jnp.allclose(out3.astype(jnp.float32), ref2, atol=5e-2, rtol=5e-2), \
        "mismatch vs reference (check 3, bf16)"

    print("KERNEL_OK")
</pallas_src>

<mosaic_0001>
module attributes {stable_mosaic.version = 11 : i64} {
  func.func @_cnn_embedding_kernel(%arg0: i32, %arg1: memref<8x1xf32, #tpu.memory_space<vmem>>, %arg2: memref<3x32xf32, #tpu.memory_space<vmem>>, %arg3: memref<3xf32, #tpu.memory_space<smem>>, %arg4: memref<8x32xf32, #tpu.memory_space<vmem>>) attributes {dimension_semantics = [#tpu.dimension_semantics<parallel>], iteration_bounds = array<i64: 2>, scalar_prefetch = 0 : i64, scratch_operands = 0 : i64, tpu.core_type = #tpu.core_type<tc>, window_params = [{transform_indices = @transform_0, window_bounds = array<i64: 8, 1>}, {pipeline_mode = #tpu.pipeline_mode<synchronous>, transform_indices = @transform_1, window_bounds = array<i64: 3, 32>}, {transform_indices = @transform_2, window_bounds = array<i64: 3>}, {transform_indices = @transform_3, window_bounds = array<i64: 8, 32>}]} {
    %c0 = arith.constant 0 : index
    %c0_0 = arith.constant 0 : index
    %0 = vector.load %arg1[%c0, %c0_0] : memref<8x1xf32, #tpu.memory_space<vmem>>, vector<8x1xf32>
    %c0_1 = arith.constant 0 : index
    %1 = memref.load %arg3[%c0_1] : memref<3xf32, #tpu.memory_space<smem>>
    %c1 = arith.constant 1 : index
    %2 = memref.load %arg3[%c1] : memref<3xf32, #tpu.memory_space<smem>>
    %c2 = arith.constant 2 : index
    %3 = memref.load %arg3[%c2] : memref<3xf32, #tpu.memory_space<smem>>
    %4 = arith.mulf %0, %0 : vector<8x1xf32>
    %5 = vector.broadcast %1 : f32 to vector<8x1xf32>
    %6 = arith.mulf %4, %5 : vector<8x1xf32>
    %7 = vector.broadcast %2 : f32 to vector<8x1xf32>
    %8 = arith.mulf %0, %7 : vector<8x1xf32>
    %9 = arith.addf %6, %8 : vector<8x1xf32>
    %10 = vector.broadcast %3 : f32 to vector<8x1xf32>
    %11 = arith.addf %9, %10 : vector<8x1xf32>
    %cst = arith.constant 0.000000e+00 : f32
    %12 = vector.broadcast %cst : f32 to vector<8x1xf32>
    %13 = arith.maximumf %11, %12 : vector<8x1xf32>
    %cst_2 = arith.constant 9.99999974E-6 : f32
    %14 = vector.broadcast %cst_2 : f32 to vector<8x1xf32>
    %15 = arith.addf %13, %14 : vector<8x1xf32>
    %16 = math.rsqrt %15 : vector<8x1xf32>
    %c0_3 = arith.constant 0 : index
    %c0_4 = arith.constant 0 : index
    %17 = vector.load %arg2[%c0_3, %c0_4] : memref<3x32xf32, #tpu.memory_space<vmem>>, vector<1x32xf32>
    %c1_5 = arith.constant 1 : index
    %c0_6 = arith.constant 0 : index
    %18 = vector.load %arg2[%c1_5, %c0_6] : memref<3x32xf32, #tpu.memory_space<vmem>>, vector<1x32xf32>
    %c2_7 = arith.constant 2 : index
    %c0_8 = arith.constant 0 : index
    %19 = vector.load %arg2[%c2_7, %c0_8] : memref<3x32xf32, #tpu.memory_space<vmem>>, vector<1x32xf32>
    %20 = vector.broadcast %0 : vector<8x1xf32> to vector<8x32xf32>
    %21 = vector.broadcast %17 : vector<1x32xf32> to vector<8x32xf32>
    %22 = arith.mulf %20, %21 : vector<8x32xf32>
    %23 = vector.broadcast %18 : vector<1x32xf32> to vector<8x32xf32>
    %24 = arith.addf %22, %23 : vector<8x32xf32>
    %25 = vector.broadcast %16 : vector<8x1xf32> to vector<8x32xf32>
    %26 = arith.mulf %25, %24 : vector<8x32xf32>
    %27 = vector.broadcast %19 : vector<1x32xf32> to vector<8x32xf32>
    %28 = arith.addf %26, %27 : vector<8x32xf32>
    %cst_9 = arith.constant 0.000000e+00 : f32
    %29 = vector.broadcast %cst_9 : f32 to vector<8x32xf32>
    %30 = arith.maximumf %28, %29 : vector<8x32xf32>
    %c0_10 = arith.constant 0 : index
    %c0_11 = arith.constant 0 : index
    %31 = vector.load %arg4[%c0_10, %c0_11] : memref<8x32xf32, #tpu.memory_space<vmem>>, vector<8x32xf32>
    tpu.vector_store %arg4[%c0_10, %c0_11], %30 {strides = array<i32>} : memref<8x32xf32, #tpu.memory_space<vmem>>, vector<8x32xf32>,
    return
  }
  func.func @transform_0(%arg0: i32) -> (i32, i32) {
    %c0_i32 = arith.constant 0 : i32
    %c0_i32_0 = arith.constant 0 : i32
    return %arg0, %c0_i32 : i32, i32
  }
  func.func @transform_1(%arg0: i32) -> (i32, i32) {
    %c0_i32 = arith.constant 0 : i32
    %c0_i32_0 = arith.constant 0 : i32
    %c0_i32_1 = arith.constant 0 : i32
    return %c0_i32, %c0_i32_0 : i32, i32
  }
  func.func @transform_2(%arg0: i32) -> i32 {
    %c0_i32 = arith.constant 0 : i32
    %c0_i32_0 = arith.constant 0 : i32
    return %c0_i32 : i32
  }
  func.func @transform_3(%arg0: i32) -> (i32, i32) {
    %c0_i32 = arith.constant 0 : i32
    %c0_i32_0 = arith.constant 0 : i32
    return %arg0, %c0_i32 : i32, i32
  }
}

</mosaic_0001>

<bundles_post_ra>
// kernel: tpu_custom_call.1
= control target key start
LH: loop header
LB: loop body
LE: loop exit
PB: predicated region body
PF: predicated region fallthrough
CT: control target
= control target key end

     0   :  { %8 = vsyncpa [#allocation4], 0  ;;  %s616_s0 = inlined_call_operand.vmem [shape: f32[16,1], index: 0, kind: input, shape index: {}]   ;;  %s617_s1 = inlined_call_operand.vmem [shape: f32[3,32], index: 1, kind: input, shape index: {}]   ;;  %s618_s2 = inlined_call_operand.vmem [shape: f32[3], index: 2, kind: input, shape index: {}]   ;;  %s619_s3 = inlined_call_operand.hbm [shape: f32[16,32], index: 3, kind: output, shape index: {}]  }
   0x1   :  { %9 = vsyncpa [#allocation3], 0 }
   0x2   :  { %11 = vsyncpa [#allocation3 + $0x1], 0  ;;  %s489_s12 = smov 0   ;;  %s491_s13 = smov 0  }
   0x3   :  { %s493_s14 = smov 0   ;;  %s495_s15 = smov 0  }
   0x4 LB: > { %s510_s16 = sadd.s32 4294967295, %s464_s15   ;;  %s312_s17 = sadd.s32 4294967294, %s464_s15   ;;  %s464_s15 = sphi %s495_s15, %s626_s15   ;;  %s460_s14 = sphi %s493_s14, %s625_s14   ;;  %s456_s13 = sphi %s491_s13, %s624_s13   ;;  %s452_s12 = sphi %s489_s12, %s623_s12  }
   0x5   : > { %s514_s18 = sadd.s32 1, %s464_s15   ;;  %s92_s19 = sadd.s32 1, %s460_s14 }
   0x6   : > { %s89_s20 = ssub.s32 %s464_s15, %s514_s18  ;;  %p102_p0 = scmp.ne.s32.totalorder %s460_s14, %s456_s13 }
   0x7   : > { %p90_p1 = scmp.eq.s32.totalorder %s89_s20, 0  ;;  %p103_p2 = scmp.eq.s32.totalorder %s510_s16, 1 }
   0x8   : > { %p108_p3 = scmp.ne.s32.totalorder %s456_s13, %s452_s12  ;;  %p109_p4 = scmp.eq.s32.totalorder %s312_s17, 1 }
   0x9   : > { %s525_s21 = scalar_select %p90_p1, %s460_s14, %s92_s19  }
   0xa   : > { %p527_p5 = por %p103_p2, %p102_p0  ;;  %p531_p6 = por %p109_p4, %p108_p3 }
   0xb   : > { %p313_p7 = scmp.ge.s32.totalorder %s464_s15, 1  ;;  %p116_p8 = scmp.lt.s32.totalorder %s464_s15, 3 }
   0xc   : > { %p343_p9 = scmp.eq.s32.totalorder %s510_s16, 0  ;;  %s132_s27 = sshll.u32 %s618_s2, 4  ;;  %s133_s27 = int_to_ptr.vmem [resolvable:$true] %s132_s27 }
   0xd   : > { %p538_p10 = pnand %p313_p7, %p116_p8  ;;  %s383_s28 = scalar_lea.vmem %s133_s27, 16 }
   0xe   : > { %p384_p13 = scmp.ne.s32.totalorder %s133_s27, %s383_s28  ;;  %p391_p3 = scmp.lt.s32.totalorder %s133_s27, %s133_s27 }
   0xf   : > { %p335_p11 = pneg %p538_p10  ;;  %p392_p4 = scmp.lt.s32.totalorder %s383_s28, %s383_s28 }
  0x11   : > { %p336_p12 = pnand %p343_p9, %p335_p11  ;;  %p393_p7 = por %p392_p4, %p391_p3 }
  0x13   : > { %p385_p0 = pneg %p336_p12 }
  0x15   : > { %p386_p1 = pnand %p385_p0, %p384_p13 }
  0x17   : > { %p387_p2 = pneg %p386_p1 }
  0x19   : > { %p394_p8 = pnand %p393_p7, %p387_p2 }
  0x1b   : > { %397 = shalt.err (!%p394_p8)
}
  0x1c   : > { %s466_s29 = smov [#allocation2]   ;;  %152 = sbr.rel (%p538_p10) target bundleno = 216 (0xd8), region = 32 }
  0x1d   : > { %338 = dma.vmem_to_smem (!%p336_p12), %s133_s27, 16, %s466_s29, [#allocation4]  }
  0x23   : > { %443 = dma.done.wait (%p343_p9), [#allocation4], 16  }
  0x24   : > { %445 = vsyncadd (%p343_p9), [#allocation4], 4294967280 }
  0x25   : > { %158 = sfence }
  0x26   : > { %p176_p11 = scmp.lt.s32.totalorder %s510_s16, 1  ;;  %s181_s30 = sld [smem:[#allocation2]]  ;;  %v467_v0 = vmov 0   ;;  %v322_v13 = vld [vmem:[%s617_s1] ss:$0 sm:$0xff]  ;;  %vm225_vm0 = vcmask 261120  }
  0x27   : > { %380 = vset.pattern.permute.xlu0 %v467_v0  ;;  %s320_s4 = sld [smem:[#allocation2 + $0x1]]  ;;  %s321_s5 = sld [smem:[#allocation2 + $0x2]]  ;;  %v323_v16 = vld [vmem:[%s617_s1 + $0x1] ss:$0 sm:$0xff]  ;;  %v324_v18 = vld [vmem:[%s617_s1 + $0x2] ss:$0 sm:$0xff] }
  0x28   : > { %s177_s6 = scalar_select %p176_p11, %s510_s16, 1 }
  0x29   : > { %s173_s19 = sand.u32 1, %s456_s13   ;;  %s326_s28 = sshll.u32 %s510_s16, 7 }
  0x2a   : > { %s319_s7 = sshll.u32 %s177_s6, 3  ;;  %s318_s25 = sshll.u32 %s173_s19, 3 }
  0x2b   : > { %s179_s10 = scalar_lea.vmem %s616_s0, %s319_s7  ;;  %s175_s29 = scalar_lea.vmem [#allocation5], %s318_s25 }
  0x2c   : > { %v180_v1 = vld [vmem:[%s179_s10] sm:$0xff]  ;;  %v185_v2 = vstv %s181_s30  ;;  %s241_s30 = sshll.u32 %s175_s29, 4  ;;  %s574_s6 = scalar_lea.hbm %s619_s3, %s326_s28  ;;  %s576_s30 = int_to_ptr.vmem [resolvable:$true] %s241_s30 }
  0x2d   : > { %v187_v3 = vstv %s320_s4  ;;  %200 = vperm.xlu0 %380, %v180_v1   ;;  %v184_v4 = vmul.f32 %v180_v1, %v180_v1  ;;  %v190_v7 = vstv %s321_s5  ;;  %s228_s7 = scalar_lea.sflag [#allocation3], %s173_s19  ;;  %s398_s8 = scalar_lea.vmem %s576_s30, 128 }
  0x2e   : > { %v188_v5 = vmul.f32 %v187_v3, %v180_v1  ;;  %p399_p9 = scmp.ne.s32.totalorder %s576_s30, %s398_s8  ;;  %s468_s16 = smov [#allocation5]  }
  0x2f   : > { %v186_v6 = vmul.f32 %v185_v2, %v184_v4  ;;  %s402_s9 = sshll.u32 %s468_s16, 4  ;;  %s403_s9 = int_to_ptr.vmem [resolvable:$false] %s402_s9 }
  0x30   : > { %p400_p10 = pnand %p399_p9, %p527_p5  ;;  %s404_s10 = scalar_lea.vmem %s403_s9, 256 }
  0x31   : > { %v189_v8 = vadd.f32 %v188_v5, %v186_v6  ;;  %p405_p13 = scmp.lt.s32.totalorder %s576_s30, %s403_s9  ;;  %p406_p0 = scmp.lt.s32.totalorder %s404_s10, %s398_s8 }
  0x32   : > { %p401_p12 = pneg %p400_p10 }
  0x33   : > { %v191_v9 = vadd.f32 %v190_v7, %v189_v8  ;;  %p407_p1 = por %p406_p0, %p405_p13 }
  0x35   : > { %v192_v10 = vmax.f32 %v191_v9, 0.0  ;;  %p408_p2 = pnand %p407_p1, %p401_p12 }
  0x37   : > { %v193_v11 = vadd.f32 1e-05, %v192_v10 }
  0x39   : > { %381 = vrsqrt.f32 %v193_v11 }
  0x43   : > { %v382_v12 = vpop.eup %381 }
  0x44   : > { %215 = vperm.xlu0 %380, %v382_v12  }
  0xac   : > { %v201_v14 = vpop.permute.xlu0 %200 }
  0xad   : > { %v207_v15 = vmul.f32 %v322_v13, %v201_v14 }
  0xaf   : > { %v212_v17 = vadd.f32 %v323_v16, %v207_v15 }
  0xc3   : > { %v216_v19 = vpop.permute.xlu0 %215 }
  0xc4   : > { %v218_v20 = vmul.f32 %v216_v19, %v212_v17 }
  0xc6   : > { %v223_v21 = vadd.f32 %v324_v18, %v218_v20 }
  0xc8   : > { %v224_v22 = vmax.f32 %v223_v21, 0.0 }
  0xca   : > { %226 = vst.msk [vmem:[%s175_s29] sm:$0xff] %vm225_vm0, %v224_v22 }
  0xcb   : > { %411 = shalt.err (!%p408_p2)
}
  0xcc   : > { %s412_s11 = scalar_lea.hbm %s574_s6, 128  ;;  %s416_s20 = scalar_lea.hbm %s619_s3, 256 }
  0xcd   : > { %p413_p3 = scmp.ne.s32.totalorder %s574_s6, %s412_s11  ;;  %p417_p8 = scmp.lt.u32.totalorder %s574_s6, %s619_s3 }
  0xce   : > { %p418_p11 = scmp.lt.u32.totalorder %s416_s20, %s412_s11  ;;  %p420_p10 = scmp.lt.u32.totalorder %s412_s11, %s574_s6 }
  0xcf   : > { %p414_p4 = pnand %p413_p3, %p527_p5 }
  0xd0   : > { %p419_p9 = por %p418_p11, %p417_p8 }
  0xd1   : > { %p415_p7 = pneg %p414_p4 }
  0xd2   : > { %p421_p12 = por %p420_p10, %p419_p9 }
  0xd4   : > { %p422_p13 = pnand %p421_p12, %p415_p7 }
  0xd6   : > { %425 = shalt.err (!%p422_p13)
}
  0xd7   : > { %333 = dma.vmem_to_hbm [thread:$0]  (%p527_p5), %s576_s30, 128, %s574_s6, %s228_s7  }
  0xd8 PF: > { %p345_p0 = scmp.ge.s32.totalorder %s464_s15, 2  ;;  %s253_s26 = sand.u32 1, %s452_s12  }
  0xd9   : > { %s254_s27 = scalar_lea.sflag [#allocation3], %s253_s26 }
  0xda   : > { %p340_p1 = pnand %p345_p0, %p531_p6 }
  0xdc   : > { %447 = dma.done.wait (!%p340_p1), %s254_s27, 128  }
  0xdd   : > { %449 = vsyncadd (!%p340_p1), %s254_s27, 4294967168  ;;  %p14_p2 = scmp.ge.s32.totalorder %s514_s18, 4   ;;  %s623_s12 = smov %s456_s13 }
  0xde   : > { %s624_s13 = smov %s460_s14  ;;  %s625_s14 = smov %s525_s21 }
  0xdf   : > { %s626_s15 = smov %s514_s18  ;;  %16 = sbr.rel (!%p14_p2) target bundleno = 4 (0x4), region = 72 }
  0xe6   :  { %259 = vsyncpa [#allocation3], 1 }
  0xe7   :  { %261 = vsyncpa [#allocation3 + $0x1], 1 }
  0xe8   :  { %262 = vsyncpa [#allocation4], 1 }
  0xe9   :  { %264 = vsyncpa [#allocation4 + $0x1], 1 }

</bundles_post_ra>
